<compile_context>
chip_gen: v7x
topology: tpu7x:2x2x1
jax: 0.10.0
libtpu: 0.0.40
codegen_flags: <defaults>
</compile_context>

<pallas_src>
import functools

import jax
import jax.numpy as jnp
from jax.experimental import pallas as pl
from jax.experimental.pallas import tpu as pltpu


def _round_up(x, m):
    return (x + m - 1) // m * m


# --- one-time capability probes (no per-call try/except, no device syncs) ---
_WEIGHT_SPEC_KW = (
    {"pipeline_mode": pl.Buffered(1)} if hasattr(pl, "Buffered") else {})


def _vmem_capacity_bytes():
    try:
        return int(pltpu.get_tpu_info().vmem_capacity_bytes)
    except Exception:
        return 64 << 20          # conservative: v7x has 64 MiB per TensorCore


_VMEM_CAP = _vmem_capacity_bytes()


def _embedding_net_kernel(x_ref, w1_ref, b1_ref, w2_ref, b2_ref,
                          emb_ref, outz_ref):
    # fc1 + ReLU (MXU matmul with f32 accumulation; bias/ReLU on the VPU).
    x = x_ref[...].astype(w1_ref.dtype)
    h = jnp.dot(x, w1_ref[...],
                preferred_element_type=jnp.float32) + b1_ref[...]
    emb = jnp.maximum(h, 0.0)
    emb_ref[...] = emb.astype(emb_ref.dtype)

    # fc2
    z = jnp.dot(emb.astype(w2_ref.dtype), w2_ref[...],
                preferred_element_type=jnp.float32) + b2_ref[...]

    # F.normalize(z, dim=1): z / max(||z||, 1e-12) == z * rsqrt(max(||z||^2, 1e-24)).
    sum_sq = jnp.sum(z * z, axis=1, keepdims=True)
    inv_norm = jax.lax.rsqrt(jnp.maximum(sum_sq, 1e-24))
    outz_ref[...] = (z * inv_norm).astype(outz_ref.dtype)


@functools.partial(jax.jit, static_argnames=("block_b", "embedding_dtype"))
def _forward(x, w1_t, b1_2d, w2_t, b2_2d, *, block_b, embedding_dtype):
    B, res_size = x.shape
    embed_size = w1_t.shape[1]
    outz_size = w2_t.shape[1]
    grid = (pl.cdiv(B, block_b),)

    # VMEM budget: double-buffered x / emb / outz tiles, weights counted once
    # when single-buffered, plus headroom; clamped to the chip's capacity.
    lanes = lambda n: _round_up(n, 128)
    subl = lambda n: _round_up(n, 8)
    x_isz = x.dtype.itemsize
    w_isz = w1_t.dtype.itemsize
    e_isz = jnp.dtype(embedding_dtype).itemsize
    tile_bytes = block_b * (lanes(res_size) * x_isz
                            + lanes(embed_size) * e_isz
                            + lanes(outz_size) * 4)
    n_wbuf = 1 if _WEIGHT_SPEC_KW else 2
    weight_bytes = n_wbuf * (
        subl(res_size) * lanes(embed_size) * w_isz
        + subl(embed_size) * lanes(outz_size) * w_isz
        + (lanes(embed_size) + lanes(outz_size)) * 4)
    vmem_cap = max(16 << 20, _VMEM_CAP - (8 << 20))
    vmem_limit = 2 * tile_bytes + weight_bytes + (4 << 20)
    vmem_limit = int(min(max(vmem_limit, min(32 << 20, vmem_cap)), vmem_cap))

    in_specs = [
        # x: only the batch axis is tiled; the feature axis is full-extent so
        # no lane-padding / extra HBM pass is needed.
        pl.BlockSpec((block_b, res_size), lambda i: (i, 0)),
        # Weights / biases are grid-invariant (constant block index); single
        # buffered when the installed Pallas supports pipeline_mode.
        pl.BlockSpec((res_size, embed_size), lambda i: (0, 0),
                     **_WEIGHT_SPEC_KW),
        pl.BlockSpec((1, embed_size), lambda i: (0, 0), **_WEIGHT_SPEC_KW),
        pl.BlockSpec((embed_size, outz_size), lambda i: (0, 0),
                     **_WEIGHT_SPEC_KW),
        pl.BlockSpec((1, outz_size), lambda i: (0, 0), **_WEIGHT_SPEC_KW),
    ]
    out_specs = [
        pl.BlockSpec((block_b, embed_size), lambda i: (i, 0)),
        pl.BlockSpec((block_b, outz_size), lambda i: (i, 0)),
    ]

    return pl.pallas_call(
        _embedding_net_kernel,
        out_shape=(
            jax.ShapeDtypeStruct((B, embed_size), jnp.dtype(embedding_dtype)),
            jax.ShapeDtypeStruct((B, outz_size), jnp.float32),
        ),
        grid_spec=pltpu.PrefetchScalarGridSpec(
            num_scalar_prefetch=0,
            grid=grid,
            in_specs=in_specs,
            out_specs=out_specs,
        ),
        compiler_params=pltpu.CompilerParams(
            dimension_semantics=("parallel",),
            vmem_limit_bytes=vmem_limit),
    )(x, w1_t, b1_2d, w2_t, b2_2d)


def _choose_block_b(B, block_b=None):
    """Batch tile: big enough to amortize the ~0.35 us per-grid-step overhead,
    small enough that the grid always has >= 2 steps (v7x has 2 TensorCores)."""
    if B <= 8:
        return B                                   # single full-extent block
    if block_b is None:
        # Prefer >= 4 grid steps while keeping tiles >= 128 rows, cap at 512.
        block_b = max(128, min(512, _round_up(pl.cdiv(B, 4), 8)))
    max_blk = _round_up(pl.cdiv(B, 2), 8)          # guarantees >= 2 grid steps
    return max(8, min(_round_up(block_b, 8), max_blk))


def prepare_params(w1_t, b1, w2_t, b2, *, matmul_dtype=jnp.float32):
    """Cast / reshape parameters ONCE (outside the per-call path).

    w1_t: (resSize, embedSize)   -- transposed PyTorch fc1.weight
    b1:   (embedSize,)
    w2_t: (embedSize, outzSize)  -- transposed PyTorch fc2.weight
    b2:   (outzSize,)
    matmul_dtype: jnp.bfloat16 is recommended on v6e/v7x (MXU-native, halves
    weight DMA bytes); default f32 matches PyTorch exactly.
    """
    cdtype = jnp.dtype(matmul_dtype)
    return (jnp.asarray(w1_t, cdtype),
            jnp.asarray(b1, jnp.float32).reshape(1, -1),
            jnp.asarray(w2_t, cdtype),
            jnp.asarray(b2, jnp.float32).reshape(1, -1))


def embedding_net_forward(x, params, *, block_b=None,
                          embedding_dtype=jnp.float32):
    """Forward pass of Embedding_Net.

    x: (B, resSize) float32; params: output of prepare_params.
    Returns (embedding (B, embedSize), out_z (B, outzSize) float32).
    `embedding_dtype=jnp.bfloat16` halves the largest output stream (v5e win).
    """
    w1_t, b1_2d, w2_t, b2_2d = params
    blk = _choose_block_b(x.shape[0], block_b)
    return _forward(x, w1_t, b1_2d, w2_t, b2_2d, block_b=blk,
                    embedding_dtype=jnp.dtype(embedding_dtype))


def init_params(key, res_size, embed_size, outz_size):
    """weights_init: Linear.weight ~ N(0, 0.02), Linear.bias = 0."""
    k1, k2 = jax.random.split(key)
    # PyTorch Linear stores weight as (out, in); we keep the transposed
    # (in, out) version for the kernel.
    w1_t = jax.random.normal(k1, (res_size, embed_size), jnp.float32) * 0.02
    b1 = jnp.zeros((embed_size,), jnp.float32)
    w2_t = jax.random.normal(k2, (embed_size, outz_size), jnp.float32) * 0.02
    b2 = jnp.zeros((outz_size,), jnp.float32)
    return w1_t, b1, w2_t, b2


if __name__ == "__main__":
    # Small shapes consistent with the module (opt.resSize, opt.embedSize,
    # opt.outzSize); deliberately non-aligned to exercise full-extent feature
    # dims and the clipped (non-dividing) last batch block.  The auto-chosen
    # block_b gives a 2-step grid, so both v7x TensorCores get work.
    batch, res_size, embed_size, outz_size = 200, 300, 96, 48

    key = jax.random.PRNGKey(0)
    kx, kp = jax.random.split(key)
    x = jax.random.normal(kx, (batch, res_size), jnp.float32)
    w1_t, b1, w2_t, b2 = init_params(kp, res_size, embed_size, outz_size)
    params = prepare_params(w1_t, b1, w2_t, b2)   # f32: exact PyTorch match

    embedding, out_z = embedding_net_forward(x, params)
    jax.block_until_ready((embedding, out_z))

    # Reference check in plain JAX (same semantics as the PyTorch forward).
    emb_ref = jnp.maximum(x @ w1_t + b1, 0.0)
    z_ref = emb_ref @ w2_t + b2
    outz_ref = z_ref / jnp.maximum(
        jnp.sqrt(jnp.sum(z_ref * z_ref, axis=1, keepdims=True)), 1e-12)

    assert embedding.shape == (batch, embed_size)
    assert out_z.shape == (batch, outz_size)
    assert jnp.allclose(embedding, emb_ref, atol=1e-4, rtol=1e-4)
    assert jnp.allclose(out_z, outz_ref, atol=1e-4, rtol=1e-4)

    print("KERNEL_OK")
</pallas_src>

<mosaic_0001>
module attributes {stable_mosaic.version = 11 : i64} {
  func.func @_embedding_net_kernel(%arg0: i32, %arg1: memref<104x300xf32, #tpu.memory_space<vmem>>, %arg2: memref<300x96xf32, #tpu.memory_space<vmem>>, %arg3: memref<1x96xf32, #tpu.memory_space<vmem>>, %arg4: memref<96x48xf32, #tpu.memory_space<vmem>>, %arg5: memref<1x48xf32, #tpu.memory_space<vmem>>, %arg6: memref<104x96xf32, #tpu.memory_space<vmem>>, %arg7: memref<104x48xf32, #tpu.memory_space<vmem>>) attributes {dimension_semantics = [#tpu.dimension_semantics<parallel>], iteration_bounds = array<i64: 2>, scalar_prefetch = 0 : i64, scratch_operands = 0 : i64, tpu.core_type = #tpu.core_type<tc>, window_params = [{transform_indices = @transform_0, window_bounds = array<i64: 104, 300>}, {pipeline_mode = #tpu.pipeline_mode<synchronous>, transform_indices = @transform_1, window_bounds = array<i64: 300, 96>}, {pipeline_mode = #tpu.pipeline_mode<synchronous>, transform_indices = @transform_2, window_bounds = array<i64: 1, 96>}, {pipeline_mode = #tpu.pipeline_mode<synchronous>, transform_indices = @transform_3, window_bounds = array<i64: 96, 48>}, {pipeline_mode = #tpu.pipeline_mode<synchronous>, transform_indices = @transform_4, window_bounds = array<i64: 1, 48>}, {transform_indices = @transform_5, window_bounds = array<i64: 104, 96>}, {transform_indices = @transform_6, window_bounds = array<i64: 104, 48>}]} {
    %c0 = arith.constant 0 : index
    %c0_0 = arith.constant 0 : index
    %0 = vector.load %arg1[%c0, %c0_0] : memref<104x300xf32, #tpu.memory_space<vmem>>, vector<104x300xf32>
    %c0_1 = arith.constant 0 : index
    %c0_2 = arith.constant 0 : index
    %1 = vector.load %arg2[%c0_1, %c0_2] : memref<300x96xf32, #tpu.memory_space<vmem>>, vector<300x96xf32>
    %cst = arith.constant dense<0.000000e+00> : vector<104x96xf32>
    %2 = tpu.matmul %0, %1, %cst {dimension_numbers = #tpu.dot_dimension_numbers<[1], [0], [0], [1], [0, 0, 1, 1], [], []>} : vector<104x300xf32>, vector<300x96xf32>, vector<104x96xf32> -> vector<104x96xf32>
    %c0_3 = arith.constant 0 : index
    %c0_4 = arith.constant 0 : index
    %3 = vector.load %arg3[%c0_3, %c0_4] : memref<1x96xf32, #tpu.memory_space<vmem>>, vector<1x96xf32>
    %4 = vector.broadcast %3 : vector<1x96xf32> to vector<104x96xf32>
    %5 = arith.addf %2, %4 : vector<104x96xf32>
    %cst_5 = arith.constant 0.000000e+00 : f32
    %6 = vector.broadcast %cst_5 : f32 to vector<104x96xf32>
    %7 = arith.maximumf %5, %6 : vector<104x96xf32>
    %c0_6 = arith.constant 0 : index
    %c0_7 = arith.constant 0 : index
    %8 = vector.load %arg6[%c0_6, %c0_7] : memref<104x96xf32, #tpu.memory_space<vmem>>, vector<104x96xf32>
    tpu.vector_store %arg6[%c0_6, %c0_7], %7 {strides = array<i32>} : memref<104x96xf32, #tpu.memory_space<vmem>>, vector<104x96xf32>,
    %c0_8 = arith.constant 0 : index
    %c0_9 = arith.constant 0 : index
    %9 = vector.load %arg4[%c0_8, %c0_9] : memref<96x48xf32, #tpu.memory_space<vmem>>, vector<96x48xf32>
    %cst_10 = arith.constant dense<0.000000e+00> : vector<104x48xf32>
    %10 = tpu.matmul %7, %9, %cst_10 {dimension_numbers = #tpu.dot_dimension_numbers<[1], [0], [0], [1], [0, 0, 1, 1], [], []>} : vector<104x96xf32>, vector<96x48xf32>, vector<104x48xf32> -> vector<104x48xf32>
    %c0_11 = arith.constant 0 : index
    %c0_12 = arith.constant 0 : index
    %11 = vector.load %arg5[%c0_11, %c0_12] : memref<1x48xf32, #tpu.memory_space<vmem>>, vector<1x48xf32>
    %12 = vector.broadcast %11 : vector<1x48xf32> to vector<104x48xf32>
    %13 = arith.addf %10, %12 : vector<104x48xf32>
    %14 = arith.mulf %13, %13 : vector<104x48xf32>
    %cst_13 = arith.constant dense<0.000000e+00> : vector<104xf32>
    %15 = vector.multi_reduction <add>, %14, %cst_13 [1] : vector<104x48xf32> to vector<104xf32>
    %16 = vector.shape_cast %15 : vector<104xf32> to vector<104x1xf32>
    %cst_14 = arith.constant 1.000000e-24 : f32
    %17 = vector.broadcast %cst_14 : f32 to vector<104x1xf32>
    %18 = arith.maximumf %16, %17 : vector<104x1xf32>
    %19 = math.rsqrt %18 : vector<104x1xf32>
    %20 = vector.broadcast %19 : vector<104x1xf32> to vector<104x48xf32>
    %21 = arith.mulf %13, %20 : vector<104x48xf32>
    %c0_15 = arith.constant 0 : index
    %c0_16 = arith.constant 0 : index
    %22 = vector.load %arg7[%c0_15, %c0_16] : memref<104x48xf32, #tpu.memory_space<vmem>>, vector<104x48xf32>
    tpu.vector_store %arg7[%c0_15, %c0_16], %21 {strides = array<i32>} : memref<104x48xf32, #tpu.memory_space<vmem>>, vector<104x48xf32>,
    return
  }
  func.func @transform_0(%arg0: i32) -> (i32, i32) {
    %c0_i32 = arith.constant 0 : i32
    %c0_i32_0 = arith.constant 0 : i32
    return %arg0, %c0_i32 : i32, i32
  }
  func.func @transform_1(%arg0: i32) -> (i32, i32) {
    %c0_i32 = arith.constant 0 : i32
    %c0_i32_0 = arith.constant 0 : i32
    %c0_i32_1 = arith.constant 0 : i32
    return %c0_i32, %c0_i32_0 : i32, i32
  }
  func.func @transform_2(%arg0: i32) -> (i32, i32) {
    %c0_i32 = arith.constant 0 : i32
    %c0_i32_0 = arith.constant 0 : i32
    %c0_i32_1 = arith.constant 0 : i32
    return %c0_i32, %c0_i32_0 : i32, i32
  }
  func.func @transform_3(%arg0: i32) -> (i32, i32) {
    %c0_i32 = arith.constant 0 : i32
    %c0_i32_0 = arith.constant 0 : i32
    %c0_i32_1 = arith.constant 0 : i32
    return %c0_i32, %c0_i32_0 : i32, i32
  }
  func.func @transform_4(%arg0: i32) -> (i32, i32) {
    %c0_i32 = arith.constant 0 : i32
    %c0_i32_0 = arith.constant 0 : i32
    %c0_i32_1 = arith.constant 0 : i32
    return %c0_i32, %c0_i32_0 : i32, i32
  }
  func.func @transform_5(%arg0: i32) -> (i32, i32) {
    %c0_i32 = arith.constant 0 : i32
    %c0_i32_0 = arith.constant 0 : i32
    return %arg0, %c0_i32 : i32, i32
  }
  func.func @transform_6(%arg0: i32) -> (i32, i32) {
    %c0_i32 = arith.constant 0 : i32
    %c0_i32_0 = arith.constant 0 : i32
    return %arg0, %c0_i32 : i32, i32
  }
}

</mosaic_0001>

<bundles_post_ra>
// kernel: _forward.1
= control target key start
LH: loop header
LB: loop body
LE: loop exit
PB: predicated region body
PF: predicated region fallthrough
CT: control target
= control target key end

     0   :  { %s2246_s21 = smov 0   ;;  %s2248_s22 = smov 0   ;;  %s2965_s0 = inlined_call_operand.vmem [shape: f32[200,300], index: 0, kind: input, shape index: {}]   ;;  %s2966_s1 = inlined_call_operand.vmem [shape: f32[300,96], index: 1, kind: input, shape index: {}]   ;;  %s2967_s2 = inlined_call_operand.vmem [shape: f32[1,96], index: 2, kind: input, shape index: {}]   ;;  %s2968_s3 = inlined_call_operand.vmem [shape: f32[96,48], index: 3, kind: input, shape index: {}]   ;;  %s2969_s4 = inlined_call_operand.vmem [shape: f32[1,48], index: 4, kind: input, shape index: {}]   ;;  %s2970_s5 = inlined_call_operand.vmem [shape: f32[200,96], index: 5, kind: output, shape index: {0}]   ;;  %s2971_s6 = inlined_call_operand.vmem [shape: f32[200,48], index: 6, kind: output, shape index: {1}]  }
   0x1   :  { %s2250_s23 = smov 0  }
   0x2 LB: > { %s2259_s24 = sadd.s32 4294967295, %s2141_s23   ;;  %s2261_s25 = sadd.s32 1, %s2141_s23   ;;  %s2141_s23 = sphi %s2250_s23, %s2983_s23   ;;  %s2137_s22 = sphi %s2248_s22, %s2982_s22   ;;  %s2133_s21 = sphi %s2246_s21, %s2981_s21  }
   0x3   : > { %s131_s26 = ssub.s32 %s2141_s23, %s2261_s25  ;;  %s134_s27 = sadd.s32 1, %s2137_s22 }
   0x4   : > { %p132_p0 = scmp.eq.s32.totalorder %s131_s26, 0  ;;  %p144_p1 = scmp.ne.s32.totalorder %s2137_s22, %s2133_s21 }
   0x5   : > { %p145_p2 = scmp.eq.s32.totalorder %s2259_s24, 1  ;;  %p1511_p3 = scmp.ge.s32.totalorder %s2141_s23, 1 }
   0x6   : > { %s2269_s28 = scalar_select %p132_p0, %s2137_s22, %s134_s27  }
   0x7   : > { %p2271_p4 = por %p145_p2, %p144_p1  ;;  %p227_p5 = scmp.lt.s32.totalorder %s2141_s23, 3 }
   0x9   : > { %p228_p6 = pnand %p1511_p3, %p227_p5 }
   0xa   : > { %v348_v0 = vld [vmem:[%s2966_s1 + $0x80] sm:$0xff] (!%p228_p6)  ;;  %v349_v1 = vld [vmem:[%s2966_s1 + $0x88] sm:$0xff] (!%p228_p6)  ;;  %s2285_s12 = smul.u32 (!%p228_p6), 13, %s2259_s24  ;;  %v350_v5 = vld [vmem:[%s2966_s1 + $0x90] sm:$0xff] (!%p228_p6)  ;;  %v2207_v7 = vmov (!%p228_p6), 0.0|0.0   ;;  %vm2208_vm0 = vmmov (!%p228_p6), 0  }
   0xb   : > { %231 = sbr.rel (%p228_p6) target bundleno = 865 (0x361), region = 40  ;;  %v332_v2 = vld [vmem:[%s2966_s1] sm:$0xff] (!%p228_p6)  ;;  %v1795_v3 = vpack.c.bf16 (!%p228_p6), %v349_v1, %v348_v0  ;;  %v333_v4 = vld [vmem:[%s2966_s1 + $0x8] sm:$0xff] (!%p228_p6)  ;;  %v351_v6 = vld [vmem:[%s2966_s1 + $0x98] sm:$0xff] (!%p228_p6)  ;;  %1855 = vmatprep.subr.bf16.mxu1 (!%p228_p6), %v2207_v7  ;;  %v2209_v13 = vmov (!%p228_p6), 0.0   ;;  %vm417_vm1 = vcmask (!%p228_p6), 1043456  }
   0xc   : > { %v1797_v8 = vpack.c.bf16 (!%p228_p6), %v333_v4, %v332_v2  ;;  %v1799_v9 = vpack.c.bf16 (!%p228_p6), %v351_v6, %v350_v5  ;;  %v334_v10 = vld [vmem:[%s2966_s1 + $0x10] sm:$0xff] (!%p228_p6)  ;;  %v335_v11 = vld [vmem:[%s2966_s1 + $0x18] sm:$0xff] (!%p228_p6)  ;;  %v352_v12 = vld [vmem:[%s2966_s1 + $0xa0] sm:$0xff] (!%p228_p6)  ;;  %p272_p7 = scmp.lt.s32.totalorder (!%p228_p6), %s2285_s12, 24  ;;  %1705 = vmatprep.mubr.msk.f32.mxu1 (!%p228_p6), %vm2208_vm0, %v2209_v13  ;;  %vm2210_vm2 = vmmov (!%p228_p6), 1   ;;  %vm377_vm4 = vcmask (!%p228_p6), 359424  }
   0xd   : > { %1796 = vmatprep.subr.bf16.mxu0 (!%p228_p6), %v1795_v3  ;;  %v353_v14 = vld [vmem:[%s2966_s1 + $0xa8] sm:$0xff] (!%p228_p6)  ;;  %v1801_v15 = vpack.c.bf16 (!%p228_p6), %v335_v11, %v334_v10  ;;  %v336_v17 = vld [vmem:[%s2966_s1 + $0x20] sm:$0xff] (!%p228_p6)  ;;  %v354_v19 = vld [vmem:[%s2966_s1 + $0xb0] sm:$0xff] (!%p228_p6)  ;;  %vm694_vm5 = vcmask (!%p228_p6), 785408   ;;  %vm909_vm6 = vcmask (!%p228_p6), 392192  }
   0xe   : > { %1798 = vmatpush3.bf16.msra.mxu0 (!%p228_p6), %v1797_v8  ;;  %v1803_v16 = vpack.c.bf16 (!%p228_p6), %v353_v14, %v352_v12  ;;  %v337_v18 = vld [vmem:[%s2966_s1 + $0x28] sm:$0xff] (!%p228_p6)  ;;  %v355_v20 = vld [vmem:[%s2966_s1 + $0xb8] sm:$0xff] (!%p228_p6)  ;;  %v338_v23 = vld [vmem:[%s2966_s1 + $0x30] sm:$0xff] (!%p228_p6) }
   0xf   : > { %1800 = vmatprep.subr.bf16.mxu0 (!%p228_p6), %v1799_v9  ;;  %v1805_v21 = vpack.c.bf16 (!%p228_p6), %v337_v18, %v336_v17  ;;  %v1807_v22 = vpack.c.bf16 (!%p228_p6), %v355_v20, %v354_v19  ;;  %v339_v24 = vld [vmem:[%s2966_s1 + $0x38] sm:$0xff] (!%p228_p6)  ;;  %v356_v25 = vld [vmem:[%s2966_s1 + $0xc0] sm:$0xff] (!%p228_p6)  ;;  %v357_v26 = vld [vmem:[%s2966_s1 + $0xc8] sm:$0xff] (!%p228_p6) }
  0x10   : > { %v364_v28 = vld [vmem:[%s2966_s1 + $0x100] sm:$0xff] (!%p228_p6)  ;;  %v365_v29 = vld [vmem:[%s2966_s1 + $0x108] sm:$0xff] (!%p228_p6)  ;;  %v1809_v30 = vpack.c.bf16 (!%p228_p6), %v339_v24, %v338_v23  ;;  %v1811_v32 = vpack.c.bf16 (!%p228_p6), %v357_v26, %v356_v25  ;;  %v358_v35 = vld [vmem:[%s2966_s1 + $0xd0] sm:$0xff] (!%p228_p6) }
  0x11   : > { %v1828_v31 = vpack.c.bf16 (!%p228_p6), %v365_v29, %v364_v28  ;;  %v340_v33 = vld [vmem:[%s2966_s1 + $0x40] sm:$0xff] (!%p228_p6)  ;;  %v341_v34 = vld [vmem:[%s2966_s1 + $0x48] sm:$0xff] (!%p228_p6)  ;;  %v359_v36 = vld [vmem:[%s2966_s1 + $0xd8] sm:$0xff] (!%p228_p6) }
  0x12   : > { %s273_s9 = scalar_select %p272_p7, %s2285_s12, 24  ;;  %1802 = vmatpush3.bf16.msra.mxu0 %v1801_v15  ;;  %v366_v37 = vld [vmem:[%s2966_s1 + $0x110] sm:$0xff]  ;;  %v367_v38 = vld [vmem:[%s2966_s1 + $0x118] sm:$0xff]  ;;  %v368_v40 = vld [vmem:[%s2966_s1 + $0x120] sm:$0xff]  ;;  %v1813_v42 = vpack.c.bf16 %v341_v34, %v340_v33  ;;  %v1815_v43 = vpack.c.bf16 %v359_v36, %v358_v35 }
  0x13   : > { %1804 = vmatprep.subr.bf16.mxu0 %v1803_v16  ;;  %1858 = vmatpush3.bf16.msra.mxu1 %v1828_v31  ;;  %v1831_v39 = vpack.c.bf16 %v367_v38, %v366_v37  ;;  %v369_v41 = vld [vmem:[%s2966_s1 + $0x128] sm:$0xf]  ;;  %v342_v44 = vld [vmem:[%s2966_s1 + $0x50] sm:$0xff]  ;;  %v343_v45 = vld [vmem:[%s2966_s1 + $0x58] sm:$0xff]  ;;  %s1564_s20 = smul.u32 (%p2271_p4), 104, %s2259_s24 }
  0x14   : > { %s1862_s19 = smul.u32 24, %s273_s9  ;;  %1856 = vmatprep.subr.bf16.mxu1 %v2207_v7  ;;  %v360_v46 = vld [vmem:[%s2966_s1 + $0xe0] sm:$0xff]  ;;  %v361_v47 = vld [vmem:[%s2966_s1 + $0xe8] sm:$0xff]  ;;  %v1834_v48 = vpack.c.bf16 %v369_v41, %v368_v40  ;;  %vm2387_vm3 = vmpackc.low %vm417_vm1, %vm2210_vm2  ;;  %v1817_v50 = vpack.c.bf16 %v343_v45, %v342_v44 }
  0x15   : > { %v1819_v51 = vpack.c.bf16 %v361_v47, %v360_v46  ;;  %v344_v52 = vld [vmem:[%s2966_s1 + $0x60] sm:$0xff]  ;;  %v345_v53 = vld [vmem:[%s2966_s1 + $0x68] sm:$0xff]  ;;  %v362_v54 = vld [vmem:[%s2966_s1 + $0xf0] sm:$0xff]  ;;  %s2804_s30 = scalar_lea.vmem (%p2271_p4), %s2970_s5, %s1564_s20  }
  0x16   : > { %s2328_s26 = scalar_lea.vmem %s2965_s0, %s1862_s19  ;;  %1806 = vmatpush3.bf16.msra.mxu0 %v1805_v21  ;;  %v363_v55 = vld [vmem:[%s2966_s1 + $0xf8] sm:$0xff]  ;;  %v1821_v57 = vpack.c.bf16 %v345_v53, %v344_v52  ;;  %v346_v59 = vld [vmem:[%s2966_s1 + $0x70] sm:$0xff]  ;;  %v708_v37 = vld [vmem:[%s2968_s3] sm:$0xff]  ;;  %s1013_s19 = ssub.s32 (%p2271_p4), 25, %s2285_s12 }
  0x17   : > { %v294_v27 = vld [vmem:[%s2328_s26 + $0x8] sm:$0xff]  ;;  %1808 = vmatprep.subr.bf16.mxu0 %v1807_v22  ;;  %1859 = vmatpush3.bf16.msra.mxu1 %v1831_v39  ;;  %v307_v56 = vld [vmem:[%s2328_s26 + $0x70] sm:$0xff]  ;;  %v1823_v58 = vpack.c.bf16 %v363_v55, %v362_v54  ;;  %v347_v60 = vld [vmem:[%s2966_s1 + $0x78] sm:$0xff]  ;;  %p1014_p8 = scmp.lt.s32.totalorder (%p2271_p4), %s1013_s19, 13 }
  0x18   : > { %485 = vmatprep.mubr.f32.mxu0 %v294_v27  ;;  %1857 = vmatprep.subr.bf16.mxu1 %v2207_v7  ;;  %v310_v61 = vld [vmem:[%s2328_s26 + $0x88] sm:$0xff]  ;;  %v1825_v62 = vpack.c.bf16 %v347_v60, %v346_v59  ;;  %v313_v63 = vld [vmem:[%s2328_s26 + $0xa0] sm:$0xff]  ;;  %v316_v2 = vld [vmem:[%s2328_s26 + $0xb8] sm:$0xff] }
  0x19   : > { %v293_v0 = vld [vmem:[%s2328_s26] sm:$0xff]  ;;  %v296_v3 = vld [vmem:[%s2328_s26 + $0x18] sm:$0xff]  ;;  %v319_v5 = vld [vmem:[%s2328_s26 + $0xd0] sm:$0xff] }
  0x1a   : > { %1810 = vmatpush3.bf16.msra.mxu0 %v1809_v30  ;;  %v297_v1 = vld [vmem:[%s2328_s26 + $0x20] sm:$0xff]  ;;  %v300_v4 = vld [vmem:[%s2328_s26 + $0x38] sm:$0xff]  ;;  %v299_v6 = vld [vmem:[%s2328_s26 + $0x30] sm:$0xff] }
  0x1b   : > { %1812 = vmatprep.subr.bf16.mxu0 %v1811_v32  ;;  %1860 = vmatpush3.bf16.msk.msra.mxu1 %vm2387_vm3, %v1834_v48  ;;  %v303_v8 = vld [vmem:[%s2328_s26 + $0x50] sm:$0xff]  ;;  %v322_v9 = vld [vmem:[%s2328_s26 + $0xe8] sm:$0xff]  ;;  %v325_v12 = vld [vmem:[%s2328_s26 + $0x100] sm:$0xff] }
  0x1c   : > { %1837 = vmatprep.subr.bf16.mxu1 %v2207_v7  ;;  %v302_v10 = vld [vmem:[%s2328_s26 + $0x48] sm:$0xff]  ;;  %v305_v14 = vld [vmem:[%s2328_s26 + $0x60] sm:$0xff]  ;;  %v328_v16 = vld [vmem:[%s2328_s26 + $0x118] sm:$0xff] }
  0x1d   : > { %v306_v11 = vld [vmem:[%s2328_s26 + $0x68] sm:$0xff]  ;;  %v309_v15 = vld [vmem:[%s2328_s26 + $0x80] sm:$0xff]  ;;  %v308_v17 = vld [vmem:[%s2328_s26 + $0x78] sm:$0xff] }
  0x1e   : > { %1814 = vmatpush3.bf16.msra.mxu0 %v1813_v42  ;;  %1706 = vmatmul.mubr.msk.f32.vlgmr.msra.gmra.mrb[0].mxu1 %vm377_vm4, %v307_v56  ;;  %v312_v18 = vld [vmem:[%s2328_s26 + $0x98] sm:$0xff]  ;;  %v331_v19 = vld [vmem:[%s2328_s26 + $0x130] sm:$0xff]  ;;  %v314_v22 = vld [vmem:[%s2328_s26 + $0xa8] sm:$0xff] }
  0x1f   : > { %1816 = vmatprep.subr.bf16.mxu0 %v1815_v43  ;;  %1708 = vmatprep.mubr.msk.f32.mxu1 %vm2208_vm0, %v2209_v13  ;;  %v311_v20 = vld [vmem:[%s2328_s26 + $0x90] sm:$0xff]  ;;  %v318_v23 = vld [vmem:[%s2328_s26 + $0xc8] sm:$0xff]  ;;  %v317_v24 = vld [vmem:[%s2328_s26 + $0xc0] sm:$0xff] }
  0x20   : > { %v315_v21 = vld [vmem:[%s2328_s26 + $0xb0] sm:$0xff]  ;;  %v321_v25 = vld [vmem:[%s2328_s26 + $0xe0] sm:$0xff]  ;;  %v320_v26 = vld [vmem:[%s2328_s26 + $0xd8] sm:$0xff] }
  0x21   : > { %v324_v27 = vld [vmem:[%s2328_s26 + $0xf8] sm:$0xff]  ;;  %v323_v28 = vld [vmem:[%s2328_s26 + $0xf0] sm:$0xff]  ;;  %v326_v30 = vld [vmem:[%s2328_s26 + $0x108] sm:$0xff] }
  0x22   : > { %1818 = vmatpush3.bf16.msra.mxu0 %v1817_v50  ;;  %1709 = vmatmul.mubr.msk.f32.gmra.mrb[2].mxu1 %vm377_vm4, %v310_v61  ;;  %v327_v29 = vld [vmem:[%s2328_s26 + $0x110] sm:$0xff]  ;;  %v329_v32 = vld [vmem:[%s2328_s26 + $0x120] sm:$0xff]  ;;  %v298_v34 = vld [vmem:[%s2328_s26 + $0x28] sm:$0xff] }
  0x23   : > { %1820 = vmatprep.subr.bf16.mxu0 %v1819_v51  ;;  %1711 = vmatprep.mubr.msk.f32.mxu1 %vm2208_vm0, %v2209_v13  ;;  %v295_v33 = vld [vmem:[%s2328_s26 + $0x10] sm:$0xff]  ;;  %v301_v35 = vld [vmem:[%s2328_s26 + $0x40] sm:$0xff]  ;;  %v304_v36 = vld [vmem:[%s2328_s26 + $0x58] sm:$0xff] }
  0x24   : > { %v709_v38 = vld [vmem:[%s2968_s3 + $0x8] sm:$0xff]  ;;  %v710_v40 = vld [vmem:[%s2968_s3 + $0x10] sm:$0xff]  ;;  %v711_v41 = vld [vmem:[%s2968_s3 + $0x18] sm:$0xff] }
  0x25   : > { %v1841_v42 = vpack.c.bf16 %v711_v41, %v710_v40  ;;  %v712_v43 = vld [vmem:[%s2968_s3 + $0x20] sm:$0xff]  ;;  %v713_v44 = vld [vmem:[%s2968_s3 + $0x28] sm:$0xff]  ;;  %v714_v46 = vld [vmem:[%s2968_s3 + $0x30] sm:$0xff] }
  0x26   : > { %1822 = vmatpush3.bf16.msra.mxu0 %v1821_v57  ;;  %1712 = vmatmul.mubr.msk.f32.gmra.mrb[4].mxu1 %vm377_vm4, %v313_v63  ;;  %v1844_v45 = vpack.c.bf16 %v713_v44, %v712_v43  ;;  %v715_v47 = vld [vmem:[%s2968_s3 + $0x38] sm:$0xff]  ;;  %v716_v49 = vld [vmem:[%s2968_s3 + $0x40] sm:$0xff]  ;;  %v717_v50 = vld [vmem:[%s2968_s3 + $0x48] sm:$0xff] }
  0x27   : > { %1824 = vmatprep.subr.bf16.mxu0 %v1823_v58  ;;  %1714 = vmatprep.mubr.msk.f32.mxu1 %vm2208_vm0, %v2209_v13  ;;  %v1850_v51 = vpack.c.bf16 %v717_v50, %v716_v49  ;;  %v718_v52 = vld [vmem:[%s2968_s3 + $0x50] sm:$0xff]  ;;  %v719_v53 = vld [vmem:[%s2968_s3 + $0x58] sm:$0xff] }
  0x28   : > { %v1853_v54 = vpack.c.bf16 %v719_v53, %v718_v52 }
  0x2a   : > { %1826 = vmatpush3.bf16.msra.mxu0 %v1825_v62  ;;  %1715 = vmatmul.mubr.msk.f32.gmra.mrb[6].mxu1 %vm377_vm4, %v316_v2 }
  0x2b   : > { %1827 = vmatprep.subr.bf16.mxu0 %v2207_v7  ;;  %1717 = vmatprep.mubr.msk.f32.mxu1 %vm2208_vm0, %v2209_v13 }
  0x2d   : > { %486 = vmatmul.mubr.f32.vlgmr.msra.gmra.mrb[0].mxu0 %v293_v0 }
  0x2e   : > { %1829 = vmatpush3.bf16.msra.mxu0 %v1828_v31  ;;  %490 = vmatprep.mubr.f32.mxu0 %v297_v1  ;;  %v330_v31 = vld [vmem:[%s2328_s26 + $0x128] sm:$0xff]  ;;  %s257_s26 = sand.u32 1, %s2133_s21  }
  0x2f   : > { %1830 = vmatprep.subr.bf16.mxu0 %v2207_v7  ;;  %1718 = vmatmul.mubr.msk.f32.gmra.mrb[8].mxu1 %vm377_vm4, %v319_v5  ;;  %s2544_s13 = smul.u32 104, %s257_s26 }
  0x30   : > { %1720 = vmatprep.mubr.msk.f32.mxu1 %vm2208_vm0, %v2209_v13 }
  0x31   : > { %491 = vmatmul.mubr.f32.gmra.mrb[2].mxu0 %v296_v3  ;;  %s2557_s21 = scalar_lea.vmem [#allocation2], %s2544_s13   ;;  %s2757_s18 = scalar_lea.vmem [#allocation3], %s2544_s13  }
  0x32   : > { %495 = vmatprep.mubr.f32.mxu0 %v300_v4  ;;  %1832 = vmatpush3.bf16.msra.mxu0 %v1831_v39  ;;  %v1838_v39 = vpack.c.bf16 %v709_v38, %v708_v37 }
  0x33   : > { %1833 = vmatprep.subr.bf16.mxu0 %v2207_v7  ;;  %1721 = vmatmul.mubr.msk.f32.gmra.mrb[10].mxu1 %vm377_vm4, %v322_v9 }
  0x34   : > { %1723 = vmatprep.mubr.msk.f32.mxu1 %vm2208_vm0, %v2209_v13  ;;  %1839 = vmatpush3.bf16.msra.mxu1 %v1838_v39 }
  0x35   : > { %496 = vmatmul.mubr.f32.gmra.mrb[4].mxu0 %v299_v6  ;;  %1840 = vmatprep.subr.bf16.mxu1 %v2207_v7 }
  0x36   : > { %500 = vmatprep.mubr.f32.mxu0 %v303_v8  ;;  %1836 = vmatpush3.bf16.msk.msra.mxu0 %vm2387_vm3, %v1834_v48  ;;  %v1847_v48 = vpack.c.bf16 %v715_v47, %v714_v46 }
  0x37   : > { %1724 = vmatmul.mubr.msk.f32.gmra.mrb[12].mxu1 %vm377_vm4, %v325_v12 }
  0x38   : > { %1726 = vmatprep.mubr.msk.f32.mxu1 %vm2208_vm0, %v2209_v13  ;;  %1842 = vmatpush3.bf16.msra.mxu1 %v1841_v42 }
  0x39   : > { %501 = vmatmul.mubr.f32.gmra.mrb[6].mxu0 %v302_v10  ;;  %1843 = vmatprep.subr.bf16.mxu1 %v2207_v7 }
  0x3a   : > { %505 = vmatprep.mubr.f32.mxu0 %v306_v11 }
  0x3b   : > { %1727 = vmatmul.mubr.msk.f32.gmra.mrb[14].mxu1 %vm377_vm4, %v328_v16 }
  0x3c   : > { %1729 = vmatprep.mubr.msk.f32.mxu1 %vm2208_vm0, %v2209_v13  ;;  %1845 = vmatpush3.bf16.msra.mxu1 %v1844_v45 }
  0x3d   : > { %506 = vmatmul.mubr.f32.gmra.mrb[8].mxu0 %v305_v14  ;;  %1846 = vmatprep.subr.bf16.mxu1 %v2207_v7 }
  0x3e   : > { %510 = vmatprep.mubr.f32.mxu0 %v309_v15 }
  0x3f   : > { %1730 = vmatmul.mubr.msk.f32.gmra.mrb[16].mxu1 %vm377_vm4, %v331_v19 }
  0x40   : > { %1756 = vmatprep.mubr.msk.f32.mxu1 %vm2208_vm0, %v2209_v13  ;;  %1848 = vmatpush3.bf16.msra.mxu1 %v1847_v48 }
  0x41   : > { %511 = vmatmul.mubr.f32.gmra.mrb[10].mxu0 %v308_v17  ;;  %1849 = vmatprep.subr.bf16.mxu1 %v2207_v7 }
  0x42   : > { %515 = vmatprep.mubr.f32.mxu0 %v312_v18 }
  0x44   : > { %1851 = vmatpush3.bf16.msra.mxu1 %v1850_v51 }
  0x45   : > { %516 = vmatmul.mubr.f32.gmra.mrb[12].mxu0 %v311_v20  ;;  %1852 = vmatprep.subr.bf16.mxu1 %v2207_v7 }
  0x46   : > { %520 = vmatprep.mubr.f32.mxu0 %v315_v21 }
  0x48   : > { %1854 = vmatpush3.bf16.msra.mxu1 %v1853_v54 }
  0x49   : > { %521 = vmatmul.mubr.f32.gmra.mrb[14].mxu0 %v314_v22  ;;  %v2549_v22 = vld [vmem:[%s2967_s2] ss:$0 sm:$0xff] }
  0x4a   : > { %525 = vmatprep.mubr.f32.mxu0 %v318_v23 }
  0x4d   : > { %526 = vmatmul.mubr.f32.gmra.mrb[16].mxu0 %v317_v24 }
  0x4e   : > { %530 = vmatprep.mubr.f32.mxu0 %v321_v25 }
  0x51   : > { %531 = vmatmul.mubr.f32.gmra.mrb[18].mxu0 %v320_v26 }
  0x52   : > { %535 = vmatprep.mubr.f32.mxu0 %v324_v27 }
  0x55   : > { %536 = vmatmul.mubr.f32.gmra.mrb[20].mxu0 %v323_v28 }
  0x56   : > { %540 = vmatprep.mubr.f32.mxu0 %v327_v29 }
  0x59   : > { %541 = vmatmul.mubr.f32.gmra.mrb[22].mxu0 %v326_v30 }
  0x5a   : > { %545 = vmatprep.mubr.f32.mxu0 %v330_v31 }
  0x5d   : > { %546 = vmatmul.mubr.f32.gmra.mrb[24].mxu0 %v329_v32 }
  0x5e   : > { %1693 = vmatprep.mubr.msk.f32.mxu0 %vm2208_vm0, %v2209_v13 }
  0x61   : > { %1694 = vmatmul.mubr.msk.f32.vlgmr.msra.gmra.mrb[26].mxu0 %vm377_vm4, %v295_v33 }
  0x62   : > { %1696 = vmatprep.mubr.msk.f32.mxu0 %vm2208_vm0, %v2209_v13 }
  0x65   : > { %1697 = vmatmul.mubr.msk.f32.gmra.mrb[28].mxu0 %vm377_vm4, %v298_v34 }
  0x66   : > { %1699 = vmatprep.mubr.msk.f32.mxu0 %vm2208_vm0, %v2209_v13 }
  0x69   : > { %1700 = vmatmul.mubr.msk.f32.gmra.mrb[30].mxu0 %vm377_vm4, %v301_v35 }
  0x6a   : > { %1702 = vmatprep.mubr.msk.f32.mxu0 %vm2208_vm0, %v2209_v13 }
  0x6d   : > { %1703 = vmatmul.mubr.msk.f32.gmra.mrb[32].mxu0 %vm377_vm4, %v304_v36 }
  0xf1   : > { %v637_v55 = vpop.f32.mrb[0].mxu1 }
  0xf2   : > { %v1707_v56 = vpop.f32.mrb[1].mxu1 }
  0xf5   : > { %v642_v57 = vpop.f32.mrb[2].mxu1 }
  0xf6   : > { %v1710_v58 = vpop.f32.mrb[3].mxu1 }
  0xf9   : > { %v647_v59 = vpop.f32.mrb[4].mxu1 }
  0xfa   : > { %v1713_v60 = vpop.f32.mrb[5].mxu1 }
  0xfd   : > { %v652_v7 = vpop.f32.mrb[6].mxu1 }
  0xfe   : > { %v1716_v0 = vpop.f32.mrb[7].mxu1 }
 0x100   : > { %v1598_v61 = vpop.f32.mrb[0].mxu0 }
 0x101   : > { %v1599_v62 = vpop.f32.mrb[1].mxu0 }
 0x102   : > { %v2535_v63 = vadd.f32 %v1599_v62, %v1598_v61  ;;  %v657_v4 = vpop.f32.mrb[8].mxu1 }
 0x103   : > { %v1719_v5 = vpop.f32.mrb[9].mxu1 }
 0x104   : > { %v1601_v1 = vpop.f32.mrb[2].mxu0 }
 0x105   : > { %v1602_v2 = vpop.f32.mrb[3].mxu0 }
 0x106   : > { %v2537_v3 = vadd.f32 %v1602_v2, %v1601_v1  ;;  %v662_v10 = vpop.f32.mrb[10].mxu1 }
 0x107   : > { %v1722_v11 = vpop.f32.mrb[11].mxu1 }
 0x108   : > { %v1604_v6 = vpop.f32.mrb[4].mxu0 }
 0x109   : > { %v1605_v8 = vpop.f32.mrb[5].mxu0 }
 0x10a   : > { %v2539_v9 = vadd.f32 %v1605_v8, %v1604_v6  ;;  %v667_v16 = vpop.f32.mrb[12].mxu1 }
 0x10b   : > { %v1725_v17 = vpop.f32.mrb[13].mxu1 }
 0x10c   : > { %v1607_v12 = vpop.f32.mrb[6].mxu0 }
 0x10d   : > { %v1608_v14 = vpop.f32.mrb[7].mxu0 }
 0x10e   : > { %v2541_v15 = vadd.f32 %v1608_v14, %v1607_v12  ;;  %v672_v21 = vpop.f32.mrb[14].mxu1  ;;  %v488_v12 = vadd.f32 %v2535_v63, %v2549_v22 }
 0x10f   : > { %v1728_v23 = vpop.f32.mrb[15].mxu1 }
 0x110   : > { %v1610_v18 = vpop.f32.mrb[8].mxu0 }
 0x111   : > { %v1611_v19 = vpop.f32.mrb[9].mxu0 }
 0x112   : > { %v1612_v20 = vadd.f32 %v1611_v19, %v1610_v18  ;;  %v677_v29 = vpop.f32.mrb[16].mxu1 }
 0x113   : > { %v1731_v30 = vpop.f32.mrb[17].mxu1 }
 0x114   : > { %v1613_v24 = vpop.f32.mrb[10].mxu0  ;;  %v508_v25 = vadd.f32 %v1612_v20, %v2549_v22 }
 0x115   : > { %v1614_v26 = vpop.f32.mrb[11].mxu0 }
 0x116   : > { %v1615_v27 = vadd.f32 %v1614_v26, %v1613_v24  ;;  %v2552_v28 = vadd.f32 %v637_v55, %v508_v25  ;;  %v493_v24 = vadd.f32 %v2537_v3, %v2549_v22 }
 0x118   : > { %v685_v31 = vmax.f32 %v2552_v28, 0.0  ;;  %v1616_v32 = vpop.f32.mrb[12].mxu0  ;;  %v513_v33 = vadd.f32 %v1615_v27, %v2549_v22 }
 0x119   : > { %v1617_v34 = vpop.f32.mrb[13].mxu0 }
 0x11a   : > { %699 = vst.msk [vmem:[%s2557_s21 + $0x20] sm:$0xff] %vm694_vm5, %v685_v31  ;;  %v1618_v35 = vadd.f32 %v1617_v34, %v1616_v32  ;;  %v2563_v36 = vadd.f32 %v642_v57, %v513_v33  ;;  %v503_v34 = vadd.f32 %v2541_v15, %v2549_v22  ;;  %v2675_v15 = vld [vmem:[%s2969_s4] ss:$0 sm:$0xff] }
 0x11c   : > { %v686_v37 = vmax.f32 %v2563_v36, 0.0  ;;  %v1619_v38 = vpop.f32.mrb[14].mxu0  ;;  %v518_v39 = vadd.f32 %v1618_v35, %v2549_v22 }
 0x11d   : > { %v1620_v40 = vpop.f32.mrb[15].mxu0 }
 0x11e   : > { %700 = vst.msk [vmem:[%s2557_s21 + $0x28] sm:$0xff] %vm694_vm5, %v686_v37  ;;  %v1621_v41 = vadd.f32 %v1620_v40, %v1619_v38  ;;  %v2571_v42 = vadd.f32 %v647_v59, %v518_v39 }
 0x120   : > { %v687_v43 = vmax.f32 %v2571_v42, 0.0  ;;  %v1622_v44 = vpop.f32.mrb[16].mxu0  ;;  %v523_v45 = vadd.f32 %v1621_v41, %v2549_v22 }
 0x121   : > { %v1623_v46 = vpop.f32.mrb[17].mxu0 }
 0x122   : > { %701 = vst.msk [vmem:[%s2557_s21 + $0x30] sm:$0xff] %vm694_vm5, %v687_v43  ;;  %v1624_v47 = vadd.f32 %v1623_v46, %v1622_v44  ;;  %v2579_v48 = vadd.f32 %v652_v7, %v523_v45 }
 0x124   : > { %v688_v49 = vmax.f32 %v2579_v48, 0.0  ;;  %v1625_v50 = vpop.f32.mrb[18].mxu0  ;;  %v528_v51 = vadd.f32 %v1624_v47, %v2549_v22 }
 0x125   : > { %v1626_v52 = vpop.f32.mrb[19].mxu0 }
 0x126   : > { %702 = vst.msk [vmem:[%s2557_s21 + $0x38] sm:$0xff] %vm694_vm5, %v688_v49  ;;  %v1627_v53 = vadd.f32 %v1626_v52, %v1625_v50  ;;  %v2587_v54 = vadd.f32 %v657_v4, %v528_v51 }
 0x128   : > { %v689_v55 = vmax.f32 %v2587_v54, 0.0  ;;  %v1628_v56 = vpop.f32.mrb[20].mxu0  ;;  %v533_v57 = vadd.f32 %v1627_v53, %v2549_v22 }
 0x129   : > { %v1629_v58 = vpop.f32.mrb[21].mxu0 }
 0x12a   : > { %703 = vst.msk [vmem:[%s2557_s21 + $0x40] sm:$0xff] %vm694_vm5, %v689_v55  ;;  %v1630_v59 = vadd.f32 %v1629_v58, %v1628_v56  ;;  %v2595_v60 = vadd.f32 %v662_v10, %v533_v57 }
 0x12c   : > { %v690_v61 = vmax.f32 %v2595_v60, 0.0  ;;  %v1631_v62 = vpop.f32.mrb[22].mxu0  ;;  %v538_v7 = vadd.f32 %v1630_v59, %v2549_v22 }
 0x12d   : > { %v1632_v0 = vpop.f32.mrb[23].mxu0 }
 0x12e   : > { %704 = vst.msk [vmem:[%s2557_s21 + $0x48] sm:$0xff] %vm694_vm5, %v690_v61  ;;  %v1633_v1 = vadd.f32 %v1632_v0, %v1631_v62  ;;  %v668_v2 = vadd.f32 %v667_v16, %v538_v7 }
 0x130   : > { %v691_v4 = vmax.f32 %v668_v2, 0.0  ;;  %v1634_v5 = vpop.f32.mrb[24].mxu0  ;;  %v543_v6 = vadd.f32 %v1633_v1, %v2549_v22 }
 0x131   : > { %v1635_v8 = vpop.f32.mrb[25].mxu0 }
 0x132   : > { %705 = vst.msk [vmem:[%s2557_s21 + $0x50] sm:$0xff] %vm694_vm5, %v691_v4  ;;  %v1636_v10 = vadd.f32 %v1635_v8, %v1634_v5  ;;  %v673_v11 = vadd.f32 %v672_v21, %v543_v6 }
 0x134   : > { %v692_v14 = vmax.f32 %v673_v11, 0.0  ;;  %v617_v17 = vpop.f32.mrb[26].mxu0  ;;  %v548_v18 = vadd.f32 %v1636_v10, %v2549_v22 }
 0x135   : > { %v618_v19 = vadd.f32 %v617_v17, %v488_v12  ;;  %v1695_v16 = vpop.f32.mrb[27].mxu0 }
 0x136   : > { %706 = vst.msk [vmem:[%s2557_s21 + $0x58] sm:$0xff] %vm694_vm5, %v692_v14  ;;  %v678_v20 = vadd.f32 %v677_v29, %v548_v18  ;;  %v498_v29 = vadd.f32 %v2539_v9, %v2549_v22 }
 0x137   : > { %v681_v23 = vmax.f32 %v618_v19, 0.0 }
 0x138   : > { %v693_v25 = vmax.f32 %v678_v20, 0.0  ;;  %v622_v21 = vpop.f32.mrb[28].mxu0 }
 0x139   : > { %695 = vst.msk [vmem:[%s2557_s21] sm:$0xff] %vm694_vm5, %v681_v23  ;;  %v623_v63 = vadd.f32 %v622_v21, %v493_v24  ;;  %v1698_v26 = vpop.f32.mrb[29].mxu0  ;;  %1757 = vmatmul.mubr.msk.f32.vlgmr.msra.gmra.mrb[18].mxu1 %vm694_vm5, %v681_v23 }
 0x13a   : > { %707 = vst.msk [vmem:[%s2557_s21 + $0x60] sm:$0xff] %vm694_vm5, %v693_v25  ;;  %1759 = vmatprep.mubr.msk.f32.mxu1 %vm2208_vm0, %v2209_v13 }
 0x13b   : > { %v682_v27 = vmax.f32 %v623_v63, 0.0 }
 0x13c   : > { %v627_v3 = vpop.f32.mrb[30].mxu0 }
 0x13d   : > { %696 = vst.msk [vmem:[%s2557_s21 + $0x8] sm:$0xff] %vm694_vm5, %v682_v27  ;;  %v628_v30 = vadd.f32 %v627_v3, %v498_v29  ;;  %v1701_v32 = vpop.f32.mrb[31].mxu0  ;;  %1760 = vmatmul.mubr.msk.f32.gmra.mrb[20].mxu1 %vm694_vm5, %v682_v27 }
 0x13e   : > { %1762 = vmatprep.mubr.msk.f32.mxu1 %vm2208_vm0, %v2209_v13 }
 0x13f   : > { %v683_v33 = vmax.f32 %v628_v30, 0.0 }
 0x140   : > { %v632_v35 = vpop.f32.mrb[32].mxu0 }
 0x141   : > { %697 = vst.msk [vmem:[%s2557_s21 + $0x10] sm:$0xff] %vm694_vm5, %v683_v33  ;;  %v633_v38 = vadd.f32 %v632_v35, %v503_v34  ;;  %v1704_v9 = vpop.f32.mrb[33].mxu0  ;;  %1763 = vmatmul.mubr.msk.f32.gmra.mrb[22].mxu1 %vm694_vm5, %v683_v33 }
 0x142   : > { %1765 = vmatprep.mubr.msk.f32.mxu1 %vm2208_vm0, %v2209_v13 }
 0x143   : > { %v684_v39 = vmax.f32 %v633_v38, 0.0 }
 0x145   : > { %698 = vst.msk [vmem:[%s2557_s21 + $0x18] sm:$0xff] %vm694_vm5, %v684_v39  ;;  %1766 = vmatmul.mubr.msk.f32.gmra.mrb[24].mxu1 %vm694_vm5, %v684_v39 }
 0x146   : > { %1768 = vmatprep.mubr.msk.f32.mxu1 %vm2208_vm0, %v2209_v13 }
 0x149   : > { %1769 = vmatmul.mubr.msk.f32.gmra.mrb[26].mxu1 %vm694_vm5, %v685_v31 }
 0x14a   : > { %1771 = vmatprep.mubr.msk.f32.mxu1 %vm2208_vm0, %v2209_v13 }
 0x14d   : > { %1772 = vmatmul.mubr.msk.f32.gmra.mrb[28].mxu1 %vm694_vm5, %v686_v37 }
 0x14e   : > { %1774 = vmatprep.mubr.msk.f32.mxu1 %vm2208_vm0, %v2209_v13 }
 0x151   : > { %1775 = vmatmul.mubr.msk.f32.gmra.mrb[30].mxu1 %vm694_vm5, %v687_v43 }
 0x152   : > { %1777 = vmatprep.mubr.msk.f32.mxu1 %vm2208_vm0, %v2209_v13 }
 0x155   : > { %1778 = vmatmul.mubr.msk.f32.gmra.mrb[32].mxu1 %vm694_vm5, %v688_v49 }
 0x156   : > { %1780 = vmatprep.mubr.msk.f32.mxu1 %vm2208_vm0, %v2209_v13 }
 0x159   : > { %1781 = vmatmul.mubr.msk.f32.gmra.mrb[34].mxu1 %vm694_vm5, %v689_v55 }
 0x15a   : > { %1783 = vmatprep.mubr.msk.f32.mxu1 %vm2208_vm0, %v2209_v13 }
 0x15d   : > { %1784 = vmatmul.mubr.msk.f32.gmra.mrb[36].mxu1 %vm694_vm5, %v690_v61 }
 0x15e   : > { %1786 = vmatprep.mubr.msk.f32.mxu1 %vm2208_vm0, %v2209_v13 }
 0x161   : > { %1787 = vmatmul.mubr.msk.f32.gmra.mrb[38].mxu1 %vm694_vm5, %v691_v4 }
 0x162   : > { %1789 = vmatprep.mubr.msk.f32.mxu1 %vm2208_vm0, %v2209_v13 }
 0x165   : > { %1790 = vmatmul.mubr.msk.f32.gmra.mrb[40].mxu1 %vm694_vm5, %v692_v14 }
 0x166   : > { %1792 = vmatprep.mubr.msk.f32.mxu1 %vm2208_vm0, %v2209_v13 }
 0x169   : > { %1793 = vmatmul.mubr.msk.f32.gmra.mrb[42].mxu1 %vm694_vm5, %v693_v25 }
 0x20c   : > { %v832_v22 = vpop.f32.mrb[18].mxu1 }
 0x20d   : > { %v2678_v28 = vadd.f32 %v2675_v15, %v832_v22  ;;  %v1758_v31 = vpop.f32.mrb[19].mxu1 }
 0x20f   : > { %v896_v36 = vmul.f32 %v2678_v28, %v2678_v28 }
 0x210   : > { %v837_v37 = vpop.f32.mrb[20].mxu1 }
 0x211   : > { %v2683_v40 = vadd.f32 %v2675_v15, %v837_v37  ;;  %v1761_v13 = vpop.f32.mrb[21].mxu1  ;;  %v910_v41 = vsel %vm909_vm6, %v896_v36, 0.0 }
 0x212   : > { %911 = vadd.xlane.f32.xlu0 %v910_v41 }
 0x213   : > { %v897_v42 = vmul.f32 %v2683_v40, %v2683_v40 }
 0x214   : > { %v842_v43 = vpop.f32.mrb[22].mxu1 }
 0x215   : > { %v2689_v44 = vadd.f32 %v2675_v15, %v842_v43  ;;  %v1764_v45 = vpop.f32.mrb[23].mxu1  ;;  %v913_v46 = vsel %vm909_vm6, %v897_v42, 0.0 }
 0x216   : > { %914 = vadd.xlane.f32.xlu0 %v913_v46 }
 0x217   : > { %v898_v47 = vmul.f32 %v2689_v44, %v2689_v44 }
 0x218   : > { %v847_v48 = vpop.f32.mrb[24].mxu1 }
 0x219   : > { %v2695_v49 = vadd.f32 %v2675_v15, %v847_v48  ;;  %v1767_v50 = vpop.f32.mrb[25].mxu1  ;;  %v916_v51 = vsel %vm909_vm6, %v898_v47, 0.0 }
 0x21a   : > { %917 = vadd.xlane.f32.xlu1 %v916_v51 }
 0x21b   : > { %v899_v52 = vmul.f32 %v2695_v49, %v2695_v49 }
 0x21c   : > { %v852_v53 = vpop.f32.mrb[26].mxu1 }
 0x21d   : > { %v2701_v54 = vadd.f32 %v2675_v15, %v852_v53  ;;  %v1770_v55 = vpop.f32.mrb[27].mxu1  ;;  %v919_v56 = vsel %vm909_vm6, %v899_v52, 0.0 }
 0x21e   : > { %920 = vadd.xlane.f32.xlu1 %v919_v56 }
 0x21f   : > { %v900_v57 = vmul.f32 %v2701_v54, %v2701_v54 }
 0x220   : > { %v857_v58 = vpop.f32.mrb[28].mxu1 }
 0x221   : > { %v2707_v59 = vadd.f32 %v2675_v15, %v857_v58  ;;  %v1773_v60 = vpop.f32.mrb[29].mxu1  ;;  %v922_v61 = vsel %vm909_vm6, %v900_v57, 0.0 }
 0x222   : > { %923 = vadd.xlane.f32.xlu0 %v922_v61 }
 0x223   : > { %v901_v62 = vmul.f32 %v2707_v59, %v2707_v59 }
 0x224   : > { %v862_v7 = vpop.f32.mrb[30].mxu1 }
 0x225   : > { %v2713_v0 = vadd.f32 %v2675_v15, %v862_v7  ;;  %v1776_v1 = vpop.f32.mrb[31].mxu1  ;;  %v925_v2 = vsel %vm909_vm6, %v901_v62, 0.0 }
 0x226   : > { %926 = vadd.xlane.f32.xlu1 %v925_v2 }
 0x227   : > { %v902_v4 = vmul.f32 %v2713_v0, %v2713_v0 }
 0x228   : > { %v867_v5 = vpop.f32.mrb[32].mxu1 }
 0x229   : > { %v2719_v6 = vadd.f32 %v2675_v15, %v867_v5  ;;  %v1779_v8 = vpop.f32.mrb[33].mxu1  ;;  %v928_v10 = vsel %vm909_vm6, %v902_v4, 0.0 }
 0x22a   : > { %929 = vadd.xlane.f32.xlu0 %v928_v10 }
 0x22b   : > { %v903_v11 = vmul.f32 %v2719_v6, %v2719_v6 }
 0x22c   : > { %v872_v12 = vpop.f32.mrb[34].mxu1 }
 0x22d   : > { %v2725_v14 = vadd.f32 %v2675_v15, %v872_v12  ;;  %v1782_v17 = vpop.f32.mrb[35].mxu1  ;;  %v931_v18 = vsel %vm909_vm6, %v903_v11, 0.0 }
 0x22e   : > { %932 = vadd.xlane.f32.xlu1 %v931_v18 }
 0x22f   : > { %v904_v19 = vmul.f32 %v2725_v14, %v2725_v14 }
 0x230   : > { %v877_v16 = vpop.f32.mrb[36].mxu1 }
 0x231   : > { %v2731_v20 = vadd.f32 %v2675_v15, %v877_v16  ;;  %v1785_v23 = vpop.f32.mrb[37].mxu1  ;;  %v934_v24 = vsel %vm909_vm6, %v904_v19, 0.0 }
 0x232   : > { %935 = vadd.xlane.f32.xlu0 %v934_v24 }
 0x233   : > { %v905_v25 = vmul.f32 %v2731_v20, %v2731_v20 }
 0x234   : > { %v882_v21 = vpop.f32.mrb[38].mxu1 }
 0x235   : > { %v2737_v63 = vadd.f32 %v2675_v15, %v882_v21  ;;  %v1788_v26 = vpop.f32.mrb[39].mxu1  ;;  %v937_v27 = vsel %vm909_vm6, %v905_v25, 0.0 }
 0x236   : > { %938 = vadd.xlane.f32.xlu1 %v937_v27 }
 0x237   : > { %v906_v29 = vmul.f32 %v2737_v63, %v2737_v63 }
 0x238   : > { %v887_v3 = vpop.f32.mrb[40].mxu1 }
 0x239   : > { %v2743_v30 = vadd.f32 %v2675_v15, %v887_v3  ;;  %v1791_v32 = vpop.f32.mrb[41].mxu1  ;;  %v940_v33 = vsel %vm909_vm6, %v906_v29, 0.0 }
 0x23a   : > { %941 = vadd.xlane.f32.xlu0 %v940_v33 }
 0x23b   : > { %v907_v34 = vmul.f32 %v2743_v30, %v2743_v30 }
 0x23c   : > { %v892_v35 = vpop.f32.mrb[42].mxu1 }
 0x23d   : > { %v2749_v38 = vadd.f32 %v2675_v15, %v892_v35  ;;  %v1794_v9 = vpop.f32.mrb[43].mxu1  ;;  %v943_v39 = vsel %vm909_vm6, %v907_v34, 0.0 }
 0x23e   : > { %944 = vadd.xlane.f32.xlu1 %v943_v39 }
 0x23f   : > { %v908_v22 = vmul.f32 %v2749_v38, %v2749_v38 }
 0x241   : > { %v946_v31 = vsel %vm909_vm6, %v908_v22, 0.0 }
 0x242   : > { %947 = vadd.xlane.f32.xlu0 %v946_v31 }
 0x29f   : > { %v912_v36 = vpop.xlane.xlu0 %911 }
 0x2a0   : > { %v949_v37 = vmax.f32 %v912_v36, 1e-24 }
 0x2a2   : > { %2021 = vrsqrt.f32 %v949_v37 }
 0x2a3   : > { %v915_v13 = vpop.xlane.xlu0 %914 }
 0x2a4   : > { %v950_v41 = vmax.f32 %v915_v13, 1e-24 }
 0x2a6   : > { %2023 = vrsqrt.f32 %v950_v41 }
 0x2a7   : > { %v918_v42 = vpop.xlane.xlu1 %917 }
 0x2a8   : > { %v951_v15 = vmax.f32 %v918_v42, 1e-24 }
 0x2aa   : > { %2025 = vrsqrt.f32 %v951_v15 }
 0x2ab   : > { %v921_v43 = vpop.xlane.xlu1 %920 }
 0x2ac   : > { %v2022_v45 = vpop.eup %2021  ;;  %v952_v46 = vmax.f32 %v921_v43, 1e-24 }
 0x2ad   : > { %v975_v47 = vmul.f32 %v2022_v45, %v2678_v28 }
 0x2ae   : > { %2027 = vrsqrt.f32 %v952_v46 }
 0x2af   : > { %988 = vst.msk [vmem:[%s2757_s18] sm:$0xff] %vm909_vm6, %v975_v47  ;;  %v924_v48 = vpop.xlane.xlu0 %923 }
 0x2b0   : > { %v2024_v50 = vpop.eup %2023  ;;  %v953_v51 = vmax.f32 %v924_v48, 1e-24 }
 0x2b1   : > { %v976_v52 = vmul.f32 %v2024_v50, %v2683_v40 }
 0x2b2   : > { %2029 = vrsqrt.f32 %v953_v51 }
 0x2b3   : > { %989 = vst.msk [vmem:[%s2757_s18 + $0x8] sm:$0xff] %vm909_vm6, %v976_v52  ;;  %v927_v53 = vpop.xlane.xlu1 %926 }
 0x2b4   : > { %v2026_v55 = vpop.eup %2025  ;;  %v954_v28 = vmax.f32 %v927_v53, 1e-24 }
 0x2b5   : > { %v977_v56 = vmul.f32 %v2026_v55, %v2689_v44 }
 0x2b6   : > { %2031 = vrsqrt.f32 %v954_v28 }
 0x2b7   : > { %990 = vst.msk [vmem:[%s2757_s18 + $0x10] sm:$0xff] %vm909_vm6, %v977_v56  ;;  %v930_v57 = vpop.xlane.xlu0 %929 }
 0x2b8   : > { %v2028_v58 = vpop.eup %2027  ;;  %v955_v60 = vmax.f32 %v930_v57, 1e-24 }
 0x2b9   : > { %v978_v61 = vmul.f32 %v2028_v58, %v2695_v49 }
 0x2ba   : > { %2033 = vrsqrt.f32 %v955_v60 }
 0x2bb   : > { %991 = vst.msk [vmem:[%s2757_s18 + $0x18] sm:$0xff] %vm909_vm6, %v978_v61  ;;  %v933_v40 = vpop.xlane.xlu1 %932 }
 0x2bc   : > { %v2030_v62 = vpop.eup %2029  ;;  %v956_v7 = vmax.f32 %v933_v40, 1e-24 }
 0x2bd   : > { %v979_v1 = vmul.f32 %v2030_v62, %v2701_v54 }
 0x2be   : > { %2035 = vrsqrt.f32 %v956_v7 }
 0x2bf   : > { %992 = vst.msk [vmem:[%s2757_s18 + $0x20] sm:$0xff] %vm909_vm6, %v979_v1  ;;  %v936_v44 = vpop.xlane.xlu0 %935 }
 0x2c0   : > { %v2032_v2 = vpop.eup %2031  ;;  %v957_v4 = vmax.f32 %v936_v44, 1e-24 }
 0x2c1   : > { %v980_v5 = vmul.f32 %v2032_v2, %v2707_v59 }
 0x2c2   : > { %2037 = vrsqrt.f32 %v957_v4 }
 0x2c3   : > { %993 = vst.msk [vmem:[%s2757_s18 + $0x28] sm:$0xff] %vm909_vm6, %v980_v5  ;;  %v939_v49 = vpop.xlane.xlu1 %938 }
 0x2c4   : > { %v2034_v8 = vpop.eup %2033  ;;  %v958_v10 = vmax.f32 %v939_v49, 1e-24 }
 0x2c5   : > { %v981_v11 = vmul.f32 %v2034_v8, %v2713_v0 }
 0x2c6   : > { %2039 = vrsqrt.f32 %v958_v10 }
 0x2c7   : > { %994 = vst.msk [vmem:[%s2757_s18 + $0x30] sm:$0xff] %vm909_vm6, %v981_v11  ;;  %v942_v54 = vpop.xlane.xlu0 %941 }
 0x2c8   : > { %v2036_v12 = vpop.eup %2035  ;;  %v959_v17 = vmax.f32 %v942_v54, 1e-24 }
 0x2c9   : > { %v982_v18 = vmul.f32 %v2036_v12, %v2719_v6 }
 0x2ca   : > { %2041 = vrsqrt.f32 %v959_v17 }
 0x2cb   : > { %995 = vst.msk [vmem:[%s2757_s18 + $0x38] sm:$0xff] %vm909_vm6, %v982_v18  ;;  %v945_v59 = vpop.xlane.xlu1 %944 }
 0x2cc   : > { %v2038_v19 = vpop.eup %2037  ;;  %v960_v16 = vmax.f32 %v945_v59, 1e-24 }
 0x2cd   : > { %v983_v23 = vmul.f32 %v2038_v19, %v2725_v14 }
 0x2ce   : > { %2043 = vrsqrt.f32 %v960_v16 }
 0x2cf   : > { %996 = vst.msk [vmem:[%s2757_s18 + $0x40] sm:$0xff] %vm909_vm6, %v983_v23  ;;  %v948_v0 = vpop.xlane.xlu0 %947 }
 0x2d0   : > { %v2040_v24 = vpop.eup %2039  ;;  %v961_v25 = vmax.f32 %v948_v0, 1e-24 }
 0x2d1   : > { %v984_v21 = vmul.f32 %v2040_v24, %v2731_v20 }
 0x2d2   : > { %2045 = vrsqrt.f32 %v961_v25 }
 0x2d3   : > { %997 = vst.msk [vmem:[%s2757_s18 + $0x48] sm:$0xff] %vm909_vm6, %v984_v21 }
 0x2d4   : > { %v2042_v6 = vpop.eup %2041 }
 0x2d5   : > { %v985_v26 = vmul.f32 %v2042_v6, %v2737_v63 }
 0x2d7   : > { %998 = vst.msk [vmem:[%s2757_s18 + $0x50] sm:$0xff] %vm909_vm6, %v985_v26 }
 0x2d8   : > { %v2044_v27 = vpop.eup %2043 }
 0x2d9   : > { %v986_v14 = vmul.f32 %v2044_v27, %v2743_v30  ;;  %1011 = sbr.rel (!%p2271_p4) target bundleno = 797 (0x31d), region = 44 }
 0x2db   : > { %999 = vst.msk [vmem:[%s2757_s18 + $0x58] sm:$0xff] %vm909_vm6, %v986_v14 }
 0x2dc   : > { %v2046_v29 = vpop.eup %2045 }
 0x2dd   : > { %v987_v3 = vmul.f32 %v2046_v29, %v2749_v38 }
 0x2df   : > { %1000 = vst.msk [vmem:[%s2757_s18 + $0x60] sm:$0xff] %vm909_vm6, %v987_v3 }
 0x2e0   : > { %s2985_s19 = smov (!%p1014_p8, %s1013_s19), 13 }
 0x2e1   : > { %s1542_s7 = sshll.u32 %s2985_s19, 7 }
 0x2e2   : > { %p1545_p9 = scmp.eq.s32.totalorder %s1542_s7, 0 }
 0x2e3   : > { %2047 = sdivrem.u32 (!%p1545_p9), %s2985_s19, 13 }
 0x2e4   : > { %1022 = sbr.rel (%p1545_p9) target bundleno = 797 (0x31d), region = 48 }
 0x2ec   : > { %s2810_s8 = spop.drf %2047 }
 0x2ed   : > { %p1546_p10 = scmp.le.s32.totalorder %s2810_s8, 0 }
 0x2ee   : > { %s2975_s10 = smov (!%p1546_p10), %s2804_s30  ;;  %s2976_s9 = smov (!%p1546_p10), %s2557_s21 }
 0x2ef   : > { %1427 = sbr.rel (%p1546_p10) target bundleno = 768 (0x300), region = 196  ;;  %s2819_s11 = smov (!%p1546_p10), 0  }
 0x2f0   : > { %s2821_s26 = smov (!%p1546_p10), 0  }
 0x2f6 LB: >> { %v1110_v20 = vld [vmem:[%s2149_s9] sm:$0xff]  ;;  %v1112_v63 = vld [vmem:[%s2149_s9 + $0x8] sm:$0xff]  ;;  %v1114_v30 = vld [vmem:[%s2149_s9 + $0x10] sm:$0xff]  ;;  %s1136_s13 = sadd.s32 1, %s2153_s11  ;;  %s1104_s26 = sadd.s32 1, %s2157_s26   ;;  %s2157_s26 = sphi %s2821_s26, %s1104_s26   ;;  %s2153_s11 = sphi %s2819_s11, %s2977_s11   ;;  %s2149_s9 = sphi %s2976_s9, %s1141_s9   ;;  %s2145_s10 = sphi %s2975_s10, %s1142_s10  }
 0x2f7   : >> { %1111 = vst [vmem:[%s2145_s10] sm:$0xff] %v1110_v20  ;;  %1113 = vst [vmem:[%s2145_s10 + $0x8] sm:$0xff] %v1112_v63  ;;  %v1116_v32 = vld [vmem:[%s2149_s9 + $0x18] sm:$0xff]  ;;  %v1118_v33 = vld [vmem:[%s2149_s9 + $0x20] sm:$0xff]  ;;  %p1137_p11 = scmp.ge.s32.totalorder %s1136_s13, %s2810_s8  ;;  %p1103_p12 = scmp.ge.s32.totalorder %s1104_s26, %s2810_s8 }
 0x2f8   : >> { %1115 = vst [vmem:[%s2145_s10 + $0x10] sm:$0xff] %v1114_v30  ;;  %v1120_v34 = vld [vmem:[%s2149_s9 + $0x28] sm:$0xff]  ;;  %1117 = vst [vmem:[%s2145_s10 + $0x18] sm:$0xff] %v1116_v32  ;;  %v1122_v35 = vld [vmem:[%s2149_s9 + $0x30] sm:$0xff] }
 0x2f9   : >> { %1119 = vst [vmem:[%s2145_s10 + $0x20] sm:$0xff] %v1118_v33  ;;  %1121 = vst [vmem:[%s2145_s10 + $0x28] sm:$0xff] %v1120_v34  ;;  %v1124_v38 = vld [vmem:[%s2149_s9 + $0x38] sm:$0xff]  ;;  %v1126_v9 = vld [vmem:[%s2149_s9 + $0x40] sm:$0xff]  ;;  %s2987_s13 = smov (%p1137_p11, %s1136_s13), 0  ;;  %1106 = sbr.rel (!%p1103_p12) target bundleno = 758 (0x2f6), region = 202 }
 0x2fa   : >> { %1123 = vst [vmem:[%s2145_s10 + $0x30] sm:$0xff] %v1122_v35  ;;  %1125 = vst [vmem:[%s2145_s10 + $0x38] sm:$0xff] %v1124_v38  ;;  %v1128_v39 = vld [vmem:[%s2149_s9 + $0x48] sm:$0xff]  ;;  %v1130_v22 = vld [vmem:[%s2149_s9 + $0x50] sm:$0xff]  ;;  %s1139_s14 = smul.u32 104, %s2987_s13  ;;  %s2977_s11 = smov %s2987_s13 }
 0x2fb   : >> { %1127 = vst [vmem:[%s2145_s10 + $0x40] sm:$0xff] %v1126_v9  ;;  %v1132_v31 = vld [vmem:[%s2149_s9 + $0x58] sm:$0xff]  ;;  %1129 = vst [vmem:[%s2145_s10 + $0x48] sm:$0xff] %v1128_v39  ;;  %v1134_v36 = vld [vmem:[%s2149_s9 + $0x60] sm:$0xff] }
 0x2fc   : >> { %1131 = vst [vmem:[%s2145_s10 + $0x50] sm:$0xff] %v1130_v22  ;;  %1133 = vst [vmem:[%s2145_s10 + $0x58] sm:$0xff] %v1132_v31  ;;  %s1141_s9 = scalar_lea.vmem %s2557_s21, %s1139_s14 [#allocation2]  }
 0x2fd   : >> { %1135 = vst [vmem:[%s2145_s10 + $0x60] sm:$0xff] %v1134_v36  ;;  %s1142_s10 = scalar_lea.vmem %s2804_s30, %s1139_s14  }
 0x300 PF: > { %2049 = sdivrem.u32 %s2985_s19, 13 }
 0x301   : > { %s1547_s15 = smul.u32 104, %s2810_s8 }
 0x303   : > { %s1147_s16 = scalar_lea.vmem %s2557_s21, %s1547_s15 [#allocation2]   ;;  %s1149_s17 = scalar_lea.vmem %s2804_s30, %s1547_s15  }
 0x309   : > { %s2050_s20 = spop.drf %2049 }
 0x30a   : > { %p1549_p13 = scmp.le.s32.totalorder %s2050_s20, 0 }
 0x30b   : > { %s2159_s23 = smov (!%p1549_p13), %s1149_s17   ;;  %s2163_s27 = smov (!%p1549_p13), %s1147_s16  }
 0x30c   : > { %1441 = sbr.rel (%p1549_p13) target bundleno = 797 (0x31d), region = 207  ;;  %s2167_s7 = smov (!%p1549_p13), 0  }
 0x30d   : > { %s2171_s14 = smov (!%p1549_p13), 0  }
 0x313 LB: >> { %v1159_v37 = vld [vmem:[%s2165_s27] sm:$0xff]  ;;  %s1161_s10 = sadd.s32 1, %s2169_s7  ;;  %s1153_s14 = sadd.s32 1, %s2173_s14   ;;  %s2173_s14 = sphi %s2171_s14, %s1153_s14   ;;  %s2169_s7 = sphi %s2167_s7, %s2168_s7   ;;  %s2165_s27 = sphi %s2163_s27, %s1166_s27   ;;  %s2161_s23 = sphi %s2159_s23, %s1167_s23  }
 0x314   : >> { %1160 = vst [vmem:[%s2161_s23] sm:$0xff] %v1159_v37  ;;  %p1162_p0 = scmp.ge.s32.totalorder %s1161_s10, %s2050_s20  ;;  %p1152_p1 = scmp.ge.s32.totalorder %s1153_s14, %s2050_s20 }
 0x316   : >> { %s2989_s10 = smov (%p1162_p0, %s1161_s10), 0  ;;  %1155 = sbr.rel (!%p1152_p1) target bundleno = 787 (0x313), region = 213 }
 0x317   : >> { %s1550_s21 = sshll.u32 %s2989_s10, 3  ;;  %s2168_s7 = smov %s2989_s10  }
 0x318   : >> { %s1166_s27 = scalar_lea.vmem %s1147_s16, %s1550_s21 [#allocation2]   ;;  %s1167_s23 = scalar_lea.vmem %s1149_s17, %s1550_s21  }
 0x31d PF: > { %1173 = sbr.rel (!%p2271_p4) target bundleno = 865 (0x361), region = 96  ;;  %s1175_s19 = ssub.s32 (%p2271_p4), 25, %s2285_s12 }
 0x31e   : > { %s1565_s30 = smul.u32 (%p2271_p4), 104, %s2259_s24  ;;  %p1176_p2 = scmp.lt.s32.totalorder (%p2271_p4), %s1175_s19, 13 }
 0x320   : > { %s2883_s11 = scalar_lea.vmem (%p2271_p4), %s2971_s6, %s1565_s30  }
 0x324   : > { %s2991_s19 = smov (!%p1176_p2, %s1175_s19), 13 }
 0x325   : > { %s1552_s26 = sshll.u32 %s2991_s19, 7 }
 0x326   : > { %p1555_p3 = scmp.eq.s32.totalorder %s1552_s26, 0 }
 0x327   : > { %2051 = sdivrem.u32 (!%p1555_p3), %s2991_s19, 13 }
 0x328   : > { %1184 = sbr.rel (%p1555_p3) target bundleno = 865 (0x361), region = 100 }
 0x330   : > { %s2889_s29 = spop.drf %2051 }
 0x331   : > { %p1556_p4 = scmp.le.s32.totalorder %s2889_s29, 0 }
 0x332   : > { %s2978_s24 = smov (!%p1556_p4), %s2883_s11  ;;  %s2979_s12 = smov (!%p1556_p4), %s2757_s18 }
 0x333   : > { %1455 = sbr.rel (%p1556_p4) target bundleno = 836 (0x344), region = 218  ;;  %s2898_s13 = smov (!%p1556_p4), 0  }
 0x334   : > { %s2900_s15 = smov (!%p1556_p4), 0  }
 0x33a LB: >> { %v1272_v13 = vld [vmem:[%s2181_s12] sm:$0xff]  ;;  %v1274_v41 = vld [vmem:[%s2181_s12 + $0x8] sm:$0xff]  ;;  %v1276_v42 = vld [vmem:[%s2181_s12 + $0x10] sm:$0xff]  ;;  %s1298_s16 = sadd.s32 1, %s2185_s13  ;;  %s1266_s15 = sadd.s32 1, %s2189_s15   ;;  %s2189_s15 = sphi %s2900_s15, %s1266_s15   ;;  %s2185_s13 = sphi %s2898_s13, %s2980_s13   ;;  %s2181_s12 = sphi %s2979_s12, %s1303_s12   ;;  %s2177_s24 = sphi %s2978_s24, %s1304_s24  }
 0x33b   : >> { %1273 = vst [vmem:[%s2177_s24] sm:$0xff] %v1272_v13  ;;  %1275 = vst [vmem:[%s2177_s24 + $0x8] sm:$0xff] %v1274_v41  ;;  %v1278_v15 = vld [vmem:[%s2181_s12 + $0x18] sm:$0xff]  ;;  %v1280_v43 = vld [vmem:[%s2181_s12 + $0x20] sm:$0xff]  ;;  %p1299_p5 = scmp.ge.s32.totalorder %s1298_s16, %s2889_s29  ;;  %p1265_p6 = scmp.ge.s32.totalorder %s1266_s15, %s2889_s29 }
 0x33c   : >> { %1277 = vst [vmem:[%s2177_s24 + $0x10] sm:$0xff] %v1276_v42  ;;  %v1282_v45 = vld [vmem:[%s2181_s12 + $0x28] sm:$0xff]  ;;  %1279 = vst [vmem:[%s2177_s24 + $0x18] sm:$0xff] %v1278_v15  ;;  %v1284_v46 = vld [vmem:[%s2181_s12 + $0x30] sm:$0xff] }
 0x33d   : >> { %1281 = vst [vmem:[%s2177_s24 + $0x20] sm:$0xff] %v1280_v43  ;;  %1283 = vst [vmem:[%s2177_s24 + $0x28] sm:$0xff] %v1282_v45  ;;  %v1286_v47 = vld [vmem:[%s2181_s12 + $0x38] sm:$0xff]  ;;  %v1288_v48 = vld [vmem:[%s2181_s12 + $0x40] sm:$0xff]  ;;  %s2993_s16 = smov (%p1299_p5, %s1298_s16), 0  ;;  %1268 = sbr.rel (!%p1265_p6) target bundleno = 826 (0x33a), region = 224 }
 0x33e   : >> { %1285 = vst [vmem:[%s2177_s24 + $0x30] sm:$0xff] %v1284_v46  ;;  %1287 = vst [vmem:[%s2177_s24 + $0x38] sm:$0xff] %v1286_v47  ;;  %v1290_v50 = vld [vmem:[%s2181_s12 + $0x48] sm:$0xff]  ;;  %v1292_v51 = vld [vmem:[%s2181_s12 + $0x50] sm:$0xff]  ;;  %s1301_s17 = smul.u32 104, %s2993_s16  ;;  %s2980_s13 = smov %s2993_s16 }
 0x33f   : >> { %1289 = vst [vmem:[%s2177_s24 + $0x40] sm:$0xff] %v1288_v48  ;;  %v1294_v52 = vld [vmem:[%s2181_s12 + $0x58] sm:$0xff]  ;;  %1291 = vst [vmem:[%s2177_s24 + $0x48] sm:$0xff] %v1290_v50  ;;  %v1296_v53 = vld [vmem:[%s2181_s12 + $0x60] sm:$0xff] }
 0x340   : >> { %1293 = vst [vmem:[%s2177_s24 + $0x50] sm:$0xff] %v1292_v51  ;;  %1295 = vst [vmem:[%s2177_s24 + $0x58] sm:$0xff] %v1294_v52  ;;  %s1303_s12 = scalar_lea.vmem %s2757_s18, %s1301_s17 [#allocation3]  }
 0x341   : >> { %1297 = vst [vmem:[%s2177_s24 + $0x60] sm:$0xff] %v1296_v53  ;;  %s1304_s24 = scalar_lea.vmem %s2883_s11, %s1301_s17  }
 0x344 PF: > { %2053 = sdivrem.u32 %s2991_s19, 13 }
 0x345   : > { %s1557_s20 = smul.u32 104, %s2889_s29 }
 0x347   : > { %s1309_s23 = scalar_lea.vmem %s2757_s18, %s1557_s20 [#allocation3]   ;;  %s1311_s27 = scalar_lea.vmem %s2883_s11, %s1557_s20  }
 0x34d   : > { %s2054_s7 = spop.drf %2053 }
 0x34e   : > { %p1559_p7 = scmp.le.s32.totalorder %s2054_s7, 0 }
 0x34f   : > { %s2191_s14 = smov (!%p1559_p7), %s1311_s27   ;;  %s2195_s10 = smov (!%p1559_p7), %s1309_s23  }
 0x350   : > { %1469 = sbr.rel (%p1559_p7) target bundleno = 865 (0x361), region = 229  ;;  %s2199_s21 = smov (!%p1559_p7), 0  }
 0x351   : > { %s2203_s30 = smov (!%p1559_p7), 0  }
 0x357 LB: >> { %v1321_v55 = vld [vmem:[%s2197_s10] sm:$0xff]  ;;  %s1323_s8 = sadd.s32 1, %s2201_s21  ;;  %s1315_s30 = sadd.s32 1, %s2205_s30   ;;  %s2205_s30 = sphi %s2203_s30, %s1315_s30   ;;  %s2201_s21 = sphi %s2199_s21, %s2200_s21   ;;  %s2197_s10 = sphi %s2195_s10, %s1328_s10   ;;  %s2193_s14 = sphi %s2191_s14, %s1329_s14  }
 0x358   : >> { %1322 = vst [vmem:[%s2193_s14] sm:$0xff] %v1321_v55  ;;  %p1324_p8 = scmp.ge.s32.totalorder %s1323_s8, %s2054_s7  ;;  %p1314_p9 = scmp.ge.s32.totalorder %s1315_s30, %s2054_s7 }
 0x35a   : >> { %s2995_s8 = smov (%p1324_p8, %s1323_s8), 0  ;;  %1317 = sbr.rel (!%p1314_p9) target bundleno = 855 (0x357), region = 235 }
 0x35b   : >> { %s1560_s18 = sshll.u32 %s2995_s8, 3  ;;  %s2200_s21 = smov %s2995_s8  }
 0x35c   : >> { %s1328_s10 = scalar_lea.vmem %s1309_s23, %s1560_s18 [#allocation3]   ;;  %s1329_s14 = scalar_lea.vmem %s1311_s27, %s1560_s18  }
 0x361 PF: > { %p14_p10 = scmp.ge.s32.totalorder %s2261_s25, 4   ;;  %s2981_s21 = smov %s2137_s22 }
 0x362   : > { %s2982_s22 = smov %s2269_s28  ;;  %s2983_s23 = smov %s2261_s25 }
 0x363   :  { %16 = sbr.rel (!%p14_p10) target bundleno = 2 (0x2), region = 246 }

</bundles_post_ra>
